<compile_context>
chip_gen: v5e
topology: v5e:2x2
jax: 0.10.0
libtpu: 0.0.40
codegen_flags: <defaults>
</compile_context>

<pallas_src>
import math

import jax
import jax.numpy as jnp
from jax.experimental import pallas as pl
from jax.experimental.pallas import tpu as pltpu


def _gfp_kernel(x_ref, w_ref, out_ref):
    # x_ref:   (TB, 1)       f32 — timestep column for this batch tile
    # w_ref:   (1, half)     f32 — raw frequency table (no pre-scaling)
    # out_ref: (TB, 2*half)  f32 — [sin | cos], lane-dense when half % 128 == 0
    half = w_ref.shape[1]
    # Exactly the spec's op order: (x * W) * pi.  One broadcasted outer
    # product + one constant multiply per tile; reused by both stores.
    proj = (x_ref[...] * w_ref[...]) * jnp.float32(math.pi)
    out_ref[:, :half] = jnp.sin(proj)
    out_ref[:, half:] = jnp.cos(proj)


def _round_up(n, m):
    return ((n + m - 1) // m) * m


def gaussian_fourier_projection(x, W, *, max_rows_per_tile=1024):
    """x: (B,) f32, W: (half,) f32 -> (B, 2*half) f32 = [sin(x*W*pi), cos(x*W*pi)]."""
    B = x.shape[0]
    half = W.shape[0]
    embed_dim = 2 * half

    w2d = W.astype(jnp.float32).reshape(1, half)

    # Batch tiling: rows a multiple of 8 (sublane), large tiles to amortize the
    # ~0.35 us per-grid-step overhead, capped so (in + out) x double-buffering
    # stays well under the scoped-VMEM default on all chips (incl. v7x 32 MiB).
    vmem_cap_bytes = 8 * 1024 * 1024
    rows_cap = max(8, vmem_cap_bytes // (embed_dim * 4 * 4))
    tb = min(_round_up(B, 8), max_rows_per_tile, _round_up(rows_cap, 8))
    b_pad = _round_up(B, tb)

    x2d = x.astype(jnp.float32).reshape(B, 1)
    if b_pad != B:
        x2d = jnp.pad(x2d, ((0, b_pad - B), (0, 0)))

    out = pl.pallas_call(
        _gfp_kernel,
        out_shape=jax.ShapeDtypeStruct((b_pad, embed_dim), jnp.float32),
        grid_spec=pl.GridSpec(
            grid=(b_pad // tb,),
            in_specs=[
                pl.BlockSpec((tb, 1), lambda i: (i, 0),
                             memory_space=pltpu.MemorySpace.VMEM),
                pl.BlockSpec((1, half), lambda i: (0, 0),
                             memory_space=pltpu.MemorySpace.VMEM),
            ],
            out_specs=pl.BlockSpec((tb, embed_dim), lambda i: (i, 0),
                                   memory_space=pltpu.MemorySpace.VMEM),
        ),
        compiler_params=pltpu.CompilerParams(
            # Batch tiles are independent: shard the grid across TensorCores
            # (~2x on v7x; harmless on single-TC v5e/v6e).
            dimension_semantics=("parallel",),
        ),
    )(x2d, w2d)

    if b_pad != B:
        out = out[:B]
    return out


if __name__ == "__main__":
    key = jax.random.PRNGKey(0)
    k_w, k_x = jax.random.split(key)

    embed_dim = 256          # half = 128 -> lane-dense output
    scale = 30.0
    batch = 8

    # Mirrors torch.randn(embed_dim // 2) * scale (fixed, non-trainable param)
    W = jax.random.normal(k_w, (embed_dim // 2,), dtype=jnp.float32) * scale
    # Scalar timestep inputs
    x = jax.random.uniform(k_x, (batch,), dtype=jnp.float32)

    out = gaussian_fourier_projection(x, W)
    out = jax.block_until_ready(out)

    # Reference check in plain JAX, same constant and op order as the spec.
    # Tolerance accounts for f32 range-reduction differences between the
    # kernel's and XLA's sin/cos for large arguments (|arg| up to ~300).
    x_proj = x[:, None] * W[None, :] * jnp.float32(math.pi)
    ref = jnp.concatenate([jnp.sin(x_proj), jnp.cos(x_proj)], axis=-1)
    assert out.shape == (batch, embed_dim)
    assert jnp.allclose(out, ref, atol=1e-4, rtol=1e-4)

    print("KERNEL_OK")
</pallas_src>

<mosaic_0001>
module attributes {stable_mosaic.version = 11 : i64} {
  func.func @_gfp_kernel(%arg0: i32, %arg1: memref<8x1xf32, #tpu.memory_space<vmem>>, %arg2: memref<1x128xf32, #tpu.memory_space<vmem>>, %arg3: memref<8x256xf32, #tpu.memory_space<vmem>>) attributes {dimension_semantics = [#tpu.dimension_semantics<parallel>], iteration_bounds = array<i64: 1>, scalar_prefetch = 0 : i64, scratch_operands = 0 : i64, tpu.core_type = #tpu.core_type<tc>, window_params = [{transform_indices = @transform_0, window_bounds = array<i64: 8, 1>}, {pipeline_mode = #tpu.pipeline_mode<synchronous>, transform_indices = @transform_1, window_bounds = array<i64: 1, 128>}, {transform_indices = @transform_2, window_bounds = array<i64: 8, 256>}]} {
    %c0 = arith.constant 0 : index
    %c0_0 = arith.constant 0 : index
    %0 = vector.load %arg1[%c0, %c0_0] : memref<8x1xf32, #tpu.memory_space<vmem>>, vector<8x1xf32>
    %c0_1 = arith.constant 0 : index
    %c0_2 = arith.constant 0 : index
    %1 = vector.load %arg2[%c0_1, %c0_2] : memref<1x128xf32, #tpu.memory_space<vmem>>, vector<1x128xf32>
    %2 = vector.broadcast %0 : vector<8x1xf32> to vector<8x128xf32>
    %3 = vector.broadcast %1 : vector<1x128xf32> to vector<8x128xf32>
    %4 = arith.mulf %2, %3 : vector<8x128xf32>
    %cst = arith.constant 3.14159274 : f32
    %5 = vector.broadcast %cst : f32 to vector<8x128xf32>
    %6 = arith.mulf %4, %5 : vector<8x128xf32>
    %7 = math.sin %6 : vector<8x128xf32>
    %c0_3 = arith.constant 0 : index
    %c0_4 = arith.constant 0 : index
    %8 = vector.load %arg3[%c0_3, %c0_4] : memref<8x256xf32, #tpu.memory_space<vmem>>, vector<8x128xf32>
    tpu.vector_store %arg3[%c0_3, %c0_4], %7 {strides = array<i32>} : memref<8x256xf32, #tpu.memory_space<vmem>>, vector<8x128xf32>,
    %9 = math.cos %6 : vector<8x128xf32>
    %c0_5 = arith.constant 0 : index
    %c128 = arith.constant 128 : index
    %10 = vector.load %arg3[%c0_5, %c128] : memref<8x256xf32, #tpu.memory_space<vmem>>, vector<8x128xf32>
    tpu.vector_store %arg3[%c0_5, %c128], %9 {strides = array<i32>} : memref<8x256xf32, #tpu.memory_space<vmem>>, vector<8x128xf32>,
    return
  }
  func.func @transform_0(%arg0: i32) -> (i32, i32) {
    %c0_i32 = arith.constant 0 : i32
    %c0_i32_0 = arith.constant 0 : i32
    return %arg0, %c0_i32 : i32, i32
  }
  func.func @transform_1(%arg0: i32) -> (i32, i32) {
    %c0_i32 = arith.constant 0 : i32
    %c0_i32_0 = arith.constant 0 : i32
    %c0_i32_1 = arith.constant 0 : i32
    return %c0_i32, %c0_i32_0 : i32, i32
  }
  func.func @transform_2(%arg0: i32) -> (i32, i32) {
    %c0_i32 = arith.constant 0 : i32
    %c0_i32_0 = arith.constant 0 : i32
    return %arg0, %c0_i32 : i32, i32
  }
}

</mosaic_0001>

<bundles_post_ra>
// kernel: tpu_custom_call.1
= control target key start
LH: loop header
LB: loop body
LE: loop exit
PB: predicated region body
PF: predicated region fallthrough
CT: control target
= control target key end

     0   :  { %v393_v1 = vmov 0   ;;  %s486_s0 = inlined_call_operand.vmem [shape: f32[8,1], index: 0, kind: input, shape index: {}]   ;;  %s487_s1 = inlined_call_operand.vmem [shape: f32[1,128], index: 1, kind: input, shape index: {}]   ;;  %s488_s2 = inlined_call_operand.hbm [shape: f32[8,256], index: 2, kind: output, shape index: {}]  }
   0x1   :  { %v12_v0 = vld [vmem:[%s486_s0] sm:$0xff]  ;;  %365 = vset.pattern.permute.xlu0 %v393_v1 }
   0x2   :  { %16 = vperm.xlu0 %365, %v12_v0  }
   0x3   :  { %7 = vsyncpa [#allocation3], 0  ;;  %v366_v2 = vld [vmem:[%s487_s1] ss:$0 sm:$0xff]  ;;  %v394_v17 = vmov 683565275  }
   0x4   :  { %v395_v19 = vmov 2475754826   ;;  %v396_v22 = vmov 2131351028   ;;  %v397_v25 = vmov 2102212464  }
   0x5   :  { %v398_v28 = vmov 920167782   ;;  %v399_v31 = vmov 1326507024   ;;  %s400_s0 = smov [#allocation2]   ;;  %s342_s15 = sshll.u32 %s488_s2, 4  ;;  %s343_s15 = int_to_ptr.hbm [resolvable:$true] %s342_s15 }
   0x6   :  { %s340_s1 = sshll.u32 %s400_s0, 4  ;;  %s341_s1 = int_to_ptr.vmem [resolvable:$true] %s340_s1 }
  0x74   :  { %v17_v3 = vpop.permute.xlu0 %16 }
  0x75   :  { %v22_v4 = vmul.f32 %v366_v2, %v17_v3 }
  0x77   :  { %v423_v5 = vmul.f32 3.1415927, %v22_v4 }
  0x79   :  { %v27_v6 = vand.u32 2139095040, %v423_v5  ;;  %v24_v9 = vand.u32 2147483647, %v423_v5  ;;  %vm26_vm12 = vcmp.lt.s32.totalorder %v423_v5, 0 }
  0x7b   :  { %v28_v7 = vshrl.u32 %v27_v6, 23  ;;  %v31_v11 = vand.u32 8388607, %v24_v9  ;;  %vm25_vm13 = vcmp.le.f32.partialorder %v24_v9, 0.7853982 }
  0x7d   :  { %v351_v8 = vadd.s32 4294967169, %v28_v7  ;;  %v32_v15 = vor.u32 8388608, %v31_v11 }
  0x7f   :  { %v34_v10 = vadd.s32 1, %v351_v8  ;;  %v440_v38 = vshll.u32 %v32_v15, 8 }
  0x81   :  { %vm35_vm0 = vcmp.gt.s32.totalorder %v34_v10, 0  ;;  %v73_v47 = vand.u32 65535, %v440_v38  ;;  %v74_v48 = vshrl.u32 %v440_v38, 16 }
  0x82   :  { %v36_v12 = vsel %vm35_vm0, %v34_v10, 0 }
  0x83   :  { %v38_v13 = vand.u32 31, %v36_v12  ;;  %v431_v16 = vshrl.u32 %v36_v12, 5 }
  0x85   :  { %v429_v14 = vsub.s32 32, %v38_v13  ;;  %v41_v18 = vshll.u32 %v394_v17, %v38_v13  ;;  %v44_v20 = vshll.u32 %v395_v19, %v38_v13  ;;  %v47_v24 = vshll.u32 %v396_v22, %v38_v13 }
  0x86   :  { %v50_v27 = vshll.u32 %v397_v25, %v38_v13  ;;  %v53_v30 = vshll.u32 %v398_v28, %v38_v13  ;;  %vm56_vm1 = vcmp.lt.s32.totalorder %v431_v16, 1  ;;  %vm59_vm2 = vcmp.lt.s32.totalorder %v431_v16, 4 }
  0x87   :  { %v42_v21 = vshrl.u32 %v395_v19, %v429_v14  ;;  %v45_v23 = vshrl.u32 %v396_v22, %v429_v14  ;;  %v48_v26 = vshrl.u32 %v397_v25, %v429_v14  ;;  %v51_v29 = vshrl.u32 %v398_v28, %v429_v14 }
  0x88   :  { %v54_v32 = vshrl.u32 %v399_v31, %v429_v14  ;;  %vm58_vm3 = vcmp.lt.s32.totalorder %v431_v16, 3  ;;  %vm57_vm4 = vcmp.lt.s32.totalorder %v431_v16, 2  ;;  %v40_v12 = vshrl.u32 %v394_v17, %v429_v14 }
  0x89   :  { %v43_v33 = vor.u32 %v42_v21, %v41_v18  ;;  %v46_v34 = vor.u32 %v45_v23, %v44_v20  ;;  %v49_v35 = vor.u32 %v48_v26, %v47_v24  ;;  %v52_v36 = vor.u32 %v51_v29, %v50_v27 }
  0x8a   :  { %v55_v37 = vor.u32 %v54_v32, %v53_v30 }
  0x8b   :  { %v64_v39 = vsel %vm56_vm1, %v43_v33, %v46_v34  ;;  %v68_v40 = vsel %vm56_vm1, %v46_v34, %v49_v35  ;;  %v65_v41 = vsel %vm59_vm2, %v52_v36, 920167782  ;;  %v61_v8 = vsel %vm59_vm2, %v49_v35, 2102212464 }
  0x8c   :  { %v69_v42 = vsel %vm59_vm2, %v55_v37, 1326507024  ;;  %v66_v43 = vsel %vm58_vm3, %v49_v35, %v65_v41  ;;  %v60_v21 = vsel %vm56_vm1, %v40_v12, %v43_v33  ;;  %v62_v22 = vsel %vm58_vm3, %v46_v34, %v61_v8 }
  0x8d   :  { %v70_v44 = vsel %vm58_vm3, %v52_v36, %v69_v42  ;;  %v67_v45 = vsel %vm57_vm4, %v64_v39, %v66_v43  ;;  %v63_v14 = vsel %vm57_vm4, %v60_v21, %v62_v22 }
  0x8e   :  { %v71_v46 = vsel %vm57_vm4, %v68_v40, %v70_v44  ;;  %v97_v51 = vand.u32 65535, %v67_v45  ;;  %v98_v52 = vshrl.u32 %v67_v45, 16  ;;  %v117_v29 = vmul.u32 %v440_v38, %v63_v14 }
  0x8f   :  { %v75_v49 = vand.u32 65535, %v71_v46  ;;  %v76_v50 = vshrl.u32 %v71_v46, 16  ;;  %vm167_vm4 = vweird.f32 %v423_v5 }
  0x90   :  { %v100_v55 = vmul.u32 %v98_v52, %v73_v47  ;;  %v101_v56 = vmul.u32 %v97_v51, %v74_v48  ;;  %v99_v60 = vmul.u32 %v97_v51, %v73_v47  ;;  %v102_v0 = vmul.u32 %v98_v52, %v74_v48 }
  0x91   :  { %v78_v53 = vmul.u32 %v76_v50, %v73_v47  ;;  %v79_v54 = vmul.u32 %v75_v49, %v74_v48  ;;  %v77_v57 = vmul.u32 %v75_v49, %v73_v47  ;;  %v80_v59 = vmul.u32 %v76_v50, %v74_v48 }
  0x92   :  { %v103_v61 = vshll.u32 %v100_v55, 16  ;;  %v105_v3 = vshll.u32 %v101_v56, 16  ;;  %v104_v19 = vshrl.u32 %v100_v55, 16  ;;  %v106_v25 = vshrl.u32 %v101_v56, 16 }
  0x93   :  { %v81_v58 = vshll.u32 %v78_v53, 16  ;;  %v83_v62 = vshll.u32 %v79_v54, 16  ;;  %v82_v13 = vshrl.u32 %v78_v53, 16  ;;  %v84_v23 = vshrl.u32 %v79_v54, 16 }
  0x94   :  { %vm107_vm6 = vc.u32 %v99_v60, %v103_v61  ;;  %v109_v4 = vadd.s32 %v103_v61, %v99_v60 }
  0x95   :  { %vm85_vm5 = vc.u32 %v77_v57, %v81_v58  ;;  %v87_v63 = vadd.s32 %v81_v58, %v77_v57  ;;  %v108_v7 = vsel %vm107_vm6, 1, %v393_v1 }
  0x96   :  { %v86_v2 = vsel %vm85_vm5, 1, %v393_v1  ;;  %v110_v11 = vadd.s32 %v108_v7, %v102_v0  ;;  %vm111_vm8 = vc.u32 %v109_v4, %v105_v3  ;;  %v113_v28 = vadd.s32 %v109_v4, %v105_v3 }
  0x97   :  { %v88_v6 = vadd.s32 %v86_v2, %v80_v59  ;;  %vm89_vm7 = vc.u32 %v87_v63, %v83_v62  ;;  %v112_v18 = vsel %vm111_vm8, 1, %v393_v1 }
  0x98   :  { %v90_v10 = vsel %vm89_vm7, 1, %v393_v1  ;;  %v114_v20 = vadd.s32 %v112_v18, %v110_v11 }
  0x99   :  { %v92_v15 = vadd.s32 %v90_v10, %v88_v6 }
  0x9a   :  { %v115_v26 = vadd.s32 %v114_v20, %v104_v19 }
  0x9b   :  { %v93_v24 = vadd.s32 %v92_v15, %v82_v13 }
  0x9c   :  { %v116_v17 = vadd.s32 %v115_v26, %v106_v25 }
  0x9d   :  { %v94_v27 = vadd.s32 %v93_v24, %v84_v23 }
  0x9e   :  { %v120_v1 = vadd.s32 1, %v116_v17 }
  0x9f   :  { %vm119_vm9 = vc.u32 %v94_v27, %v113_v28  ;;  %v118_v16 = vadd.s32 %v113_v28, %v94_v27 }
  0xa0   :  { %v121_v30 = vsel %vm119_vm9, %v120_v1, %v116_v17 }
  0xa1   :  { %v122_v31 = vadd.s32 %v121_v30, %v117_v29 }
  0xa3   :  { %v123_v32 = vadd.s32 536870912, %v122_v31 }
  0xa5   :  { %v124_v33 = vshrl.u32 %v123_v32, 30 }
  0xa7   :  { %v125_v35 = vshll.u32 %v124_v33, 30  ;;  %v148_v55 = vsub.s32 4, %v124_v33 }
  0xa9   :  { %v126_v34 = vsub.s32 %v122_v31, %v125_v35  ;;  %v149_v59 = vsel %vm26_vm12, %v148_v55, %v124_v33 }
  0xaa   :  { %v151_v62 = vsel %vm25_vm13, 0, %v149_v59 }
  0xab   :  { %vm127_vm10 = vcmp.lt.s32.totalorder %v126_v34, 0  ;;  %v128_v36 = vsub.s32 0, %v126_v34  ;;  %v168_v4 = vadd.s32 3, %v151_v62  ;;  %v324_v10 = vand.u32 3, %v151_v62 }
  0xad   :  { %v129_v37 = vsel %vm127_vm10, %v128_v36, %v126_v34  ;;  %v169_v11 = vand.u32 3, %v168_v4  ;;  %vm325_vm14 = vcmp.lt.s32.totalorder %v324_v10, 2  ;;  %vm326_vm15 = vcmp.eq.s32.totalorder %v324_v10, 0 }
  0xae   :  { %v130_v39 = vclz %v129_v37  ;;  %vm329_vm3 = vcmp.eq.s32.totalorder %v324_v10, 2 }
  0xaf   :  { %vm170_vm0 = vcmp.lt.s32.totalorder %v169_v11, 2  ;;  %vm171_vm1 = vcmp.eq.s32.totalorder %v169_v11, 0  ;;  %vm174_vm2 = vcmp.eq.s32.totalorder %v169_v11, 2 }
  0xb0   :  { %v352_v40 = vadd.s32 4294967294, %v130_v39 }
  0xb2   :  { %vm353_vm11 = vcmp.lt.s32.totalorder %v352_v40, 0 }
  0xb3   :  { %v133_v41 = vsel %vm353_vm11, 0, %v352_v40 }
  0xb4   :  { %v134_v42 = vsub.s32 32, %v133_v41  ;;  %v138_v43 = vsub.s32 4294967266, %v133_v41  ;;  %v135_v44 = vshll.u32 %v126_v34, %v133_v41 }
  0xb6   :  { %v136_v45 = vshrl.u32 %v118_v16, %v134_v42  ;;  %v139_v46 = vadd.s32 127, %v138_v43 }
  0xb8   :  { %v137_v38 = vor.u32 %v136_v45, %v135_v44  ;;  %v140_v47 = vshll.u32 %v139_v46, 23 }
  0xba   :  { %v141_v48 = vor.u32 4788187, %v140_v47  ;;  %v144_v50 = vcvt.s32.f32 %v137_v38 }
  0xbc   :  { %v142_v49 = vand.u32 2147483647, %v141_v48 }
  0xbe   :  { %v145_v51 = vmul.f32 %v144_v50, %v142_v49 }
  0xc0   :  { %v146_v52 = vxor.u32 2147483648, %v145_v51 }
  0xc2   :  { %v147_v53 = vsel %vm26_vm12, %v146_v52, %v145_v51 }
  0xc3   :  { %v150_v54 = vsel %vm25_vm13, %v423_v5, %v147_v53 }
  0xc4   :  { %v152_v56 = vmul.f32 %v150_v54, %v150_v54 }
  0xc6   :  { %v153_v57 = vmul.f32 -0.001358992, %v152_v56  ;;  %v160_v58 = vmul.f32 -0.00019511016, %v152_v56 }
  0xc8   :  { %v154_v60 = vadd.f32 0.041655596, %v153_v57  ;;  %v161_v61 = vadd.f32 0.008332121, %v160_v58 }
  0xca   :  { %v155_v63 = vmul.f32 %v154_v60, %v152_v56  ;;  %v162_v0 = vmul.f32 %v161_v61, %v152_v56 }
  0xcc   :  { %v156_v2 = vadd.f32 -0.4999988, %v155_v63  ;;  %v163_v3 = vadd.f32 -0.16666654, %v162_v0 }
  0xce   :  { %v157_v6 = vmul.f32 %v156_v2, %v152_v56  ;;  %v164_v7 = vmul.f32 %v163_v3, %v152_v56 }
  0xd0   :  { %v158_v8 = vadd.f32 1.0, %v157_v6  ;;  %v165_v9 = vadd.f32 1.0, %v164_v7 }
  0xd2   :  { %v166_v12 = vmul.f32 %v165_v9, %v150_v54  ;;  %v175_v13 = vxor.u32 2147483648, %v158_v8 }
  0xd4   :  { %v172_v15 = vxor.u32 2147483648, %v166_v12  ;;  %v176_v19 = vsel %vm174_vm2, %v175_v13, %v166_v12  ;;  %v331_v21 = vsel %vm329_vm3, %v175_v13, %v166_v12 }
  0xd6   :  { %v173_v18 = vsel %vm171_vm1, %v158_v8, %v172_v15  ;;  %v328_v20 = vsel %vm326_vm15, %v158_v8, %v172_v15 }
  0xd7   :  { %v177_v22 = vsel %vm170_vm0, %v173_v18, %v176_v19  ;;  %v332_v23 = vsel %vm325_vm14, %v328_v20, %v331_v21 }
  0xd8   :  { %v178_v24 = vsel %vm167_vm4, nan, %v177_v22  ;;  %v333_v25 = vsel %vm167_vm4, nan, %v332_v23 }
  0xd9   :  { %179 = vst [vmem:[#allocation2] sm:$0xff] %v178_v24 }
  0xda   :  { %334 = vst [vmem:[#allocation2 + $0x8] sm:$0xff] %v333_v25 }
  0xdb   :  { %345 = dma.vmem_to_hbm [thread:$0]  %s341_s1, 256, %s343_s15, [#allocation3]  }
  0xdc   :  { %391 = dma.done.wait [#allocation3], 256  }
  0xdd   :  { %392 = vsyncadd [#allocation3], 4294967040 }
  0xde   :  { %350 = vsyncpa [#allocation3], 1 }

</bundles_post_ra>
